<compile_context>
chip_gen: v7x
topology: tpu7x:2x2x1
jax: 0.10.0
libtpu: 0.0.40
codegen_flags: <defaults>
</compile_context>

<pallas_src>
import functools

import jax
import jax.numpy as jnp
from jax.experimental import pallas as pl
from jax.experimental.pallas import tpu as pltpu


def _round_up(x, m):
    return (x + m - 1) // m * m


# ----------------------------------------------------------------------------
# Plain-JAX glue: PyTorch-style bilinear resize (F.interpolate), separable form.
# ----------------------------------------------------------------------------
def resize_bilinear(x, out_h, out_w, align_corners):
    """x: (B, C, H, W) float32 -> (B, C, out_h, out_w). Matches F.interpolate bilinear."""
    B, C, H, W = x.shape

    def src_coords(out_n, in_n):
        if align_corners:
            return jnp.linspace(0.0, in_n - 1.0, out_n, dtype=jnp.float32)
        c = (jnp.arange(out_n, dtype=jnp.float32) + 0.5) * (in_n / out_n) - 0.5
        return jnp.maximum(c, 0.0)  # PyTorch clamps negative source coords to 0

    ys = src_coords(out_h, H)
    xs = src_coords(out_w, W)
    y0 = jnp.floor(ys).astype(jnp.int32)
    x0 = jnp.floor(xs).astype(jnp.int32)
    y1 = jnp.minimum(y0 + 1, H - 1)
    x1 = jnp.minimum(x0 + 1, W - 1)
    wy = (ys - y0.astype(jnp.float32))[None, None, :, None]
    wx = (xs - x0.astype(jnp.float32))[None, None, None, :]
    rows = x[:, :, y0, :] * (1.0 - wy) + x[:, :, y1, :] * wy          # (B, C, out_h, W)
    return rows[:, :, :, x0] * (1.0 - wx) + rows[:, :, :, x1] * wx    # (B, C, out_h, out_w)


# ----------------------------------------------------------------------------
# Pallas kernel: back-project -> rigid transform -> project -> grid_sample tile.
# ----------------------------------------------------------------------------
def warp_kernel(kp_ref, t_ref, uv_ref, depth_ref, img_ref, out_ref,
                *, Hs, Ws, tn, n_src_pad):
    b = pl.program_id(0)

    # Scaled intrinsics scalars from SMEM (zero-skew pinhole; reciprocals precomputed).
    fx = kp_ref[b, 0]
    fy = kp_ref[b, 1]
    cx = kp_ref[b, 2]
    cy = kp_ref[b, 3]
    inv_fx = kp_ref[b, 4]
    inv_fy = kp_ref[b, 5]

    u = uv_ref[0:1, :]          # (1, tn) output-pixel column index (precomputed on host)
    v = uv_ref[1:2, :]          # (1, tn) output-pixel row index
    depth = depth_ref[0]        # (1, tn)

    # _FvToPointcloud: P = depth * K^{-1} [u, v, 1]^T
    X = depth * ((u - cx) * inv_fx)
    Y = depth * ((v - cy) * inv_fy)
    Z = depth

    # CoordinateWarper: P' = T[:3,:3] P + T[:3,3]  (appended hom. row [0,0,0,1] is a no-op)
    Xp = t_ref[b, 0, 0] * X + t_ref[b, 0, 1] * Y + t_ref[b, 0, 2] * Z + t_ref[b, 0, 3]
    Yp = t_ref[b, 1, 0] * X + t_ref[b, 1, 1] * Y + t_ref[b, 1, 2] * Z + t_ref[b, 1, 3]
    Zp = t_ref[b, 2, 0] * X + t_ref[b, 2, 1] * Y + t_ref[b, 2, 2] * Z + t_ref[b, 2, 3]

    # _PointcloudToFv projection + grid_sample(align_corners=False) unnormalization,
    # algebraically fused with trace-time constants: ix = up * Ws/(Ws-1) - 0.5.
    inv_z = pl.reciprocal(Zp + 1e-7, approx=True)   # EUP slot, ~free next to VALU work
    up = (fx * Xp + cx * Zp) * inv_z
    vp = (fy * Yp + cy * Zp) * inv_z
    ix = up * (Ws / (Ws - 1.0)) - 0.5
    iy = vp * (Hs / (Hs - 1.0)) - 0.5

    # Bilinear corner weights, padding_mode='zeros'. Clamp before floor/int-cast so wild
    # warps (points near/behind the camera) stay well-defined; the clamp never changes an
    # in-range contribution because fully out-of-range corners get zero weight anyway.
    ixc = jnp.clip(ix, -2.0, Ws + 1.0)
    iyc = jnp.clip(iy, -2.0, Hs + 1.0)
    x0f = jnp.floor(ixc)
    y0f = jnp.floor(iyc)
    wx1 = ixc - x0f
    wy1 = iyc - y0f
    wx0 = 1.0 - wx1
    wy0 = 1.0 - wy1

    in_x0 = (x0f >= 0.0) & (x0f <= Ws - 1.0)
    in_x1 = (x0f >= -1.0) & (x0f <= Ws - 2.0)     # x1 = x0 + 1 in bounds
    in_y0 = (y0f >= 0.0) & (y0f <= Hs - 1.0)
    in_y1 = (y0f >= -1.0) & (y0f <= Hs - 2.0)     # y1 = y0 + 1 in bounds

    zero = jnp.zeros_like(wx0)
    w00 = jnp.where(in_x0 & in_y0, wx0 * wy0, zero)   # corner (x0, y0) -> base + 0
    w10 = jnp.where(in_x1 & in_y0, wx1 * wy0, zero)   # corner (x1, y0) -> base + 1
    w01 = jnp.where(in_x0 & in_y1, wx0 * wy1, zero)   # corner (x0, y1) -> base + Ws
    w11 = jnp.where(in_x1 & in_y1, wx1 * wy1, zero)   # corner (x1, y1) -> base + Ws + 1

    base = (y0f * Ws + x0f).astype(jnp.int32)         # (1, tn) flat source index of (x0, y0)

    # Gather-free grid_sample: build the (N_src, tn) scatter/weight slab for this output
    # tile (hot loop: 4 int compares + 4 selects + 3 adds per element) and contract it
    # against the resident (C, N_src) bf16 image on the MXU (f32 accumulation).
    src = jax.lax.broadcasted_iota(jnp.int32, (n_src_pad, tn), 0)
    S = (jnp.where(src == base, w00, 0.0)
         + jnp.where(src == base + 1, w10, 0.0)
         + jnp.where(src == base + Ws, w01, 0.0)
         + jnp.where(src == base + (Ws + 1), w11, 0.0))

    out_ref[0] = jnp.dot(img_ref[0], S.astype(jnp.bfloat16),
                         preferred_element_type=jnp.float32)


# ----------------------------------------------------------------------------
# Tile-size / VMEM budget helpers (v7x-safe by default).
# ----------------------------------------------------------------------------
def _estimate_vmem_bytes(n_src_pad, tn, c):
    s_elems = n_src_pad * tn
    return (s_elems * 18                    # i32 iota + ~2 live f32 temps + S f32 + S bf16
            + 2 * c * n_src_pad * 2         # double-buffered bf16 image slab
            + 2 * tn * 4                    # double-buffered depth tile
            + 2 * 2 * tn * 4                # double-buffered (u, v) tile
            + 2 * c * tn * 4                # double-buffered output tile
            + (2 << 20))                    # slack: (1, tn) geometry rows, masks, misc


def _choose_tile(n_src_pad, c, n_out, budget_bytes=40 * 1024 * 1024):
    """Largest lane-dense output tile whose per-step footprint fits a v7x-safe budget."""
    max_tn = _round_up(max(n_out, 1), 128)
    for tn in (512, 384, 256, 128):
        if tn <= max_tn and _estimate_vmem_bytes(n_src_pad, tn, c) <= budget_bytes:
            return tn
    # TODO(synk): for very large source images (N_src >~ 2^17) the source axis should be
    #             tiled too (accumulating over source slabs); keep the minimum tile here.
    return 128


# ----------------------------------------------------------------------------
# Wrapper reproducing FvToFvWarper.forward
# ----------------------------------------------------------------------------
def fv_to_fv_warper(fv_img_adjacent, depth_map, T, intrinsics, scale,
                    interp_mode="bilinear", padding_mode="zeros",
                    upsampling_mode="bilinear"):
    assert depth_map.ndim == 4 and depth_map.shape[1] == 1
    B, C, H, W = fv_img_adjacent.shape
    Hs, Ws = int(H // scale), int(W // scale)
    assert Hs > 1 and Ws > 1
    N = Hs * Ws

    # intrinsics_scale = intrinsics[:, :3, :3] / scale ; [2, 2] = 1
    K = intrinsics[:, :3, :3].astype(jnp.float32) / float(scale)
    K = K.at[:, 2, 2].set(1.0)
    fx, fy = K[:, 0, 0], K[:, 1, 1]
    cx, cy = K[:, 0, 2], K[:, 1, 2]
    kparams = jnp.stack([fx, fy, cx, cy, 1.0 / fx, 1.0 / fy], axis=1)   # (B, 6) SMEM scalars

    T34 = T[:, :3, :4].astype(jnp.float32)   # appended hom. row is a no-op for 3-D points

    # F.interpolate glue (depth: align_corners=True ; image: default align_corners=False)
    depth_s = resize_bilinear(depth_map.astype(jnp.float32), Hs, Ws, align_corners=True)[:, 0]
    img_s = resize_bilinear(fv_img_adjacent.astype(jnp.float32), Hs, Ws, align_corners=False)

    # Lane-dense padding on the host: source axis to a multiple of 128 (zero-padded image
    # columns contribute nothing), output axis to a multiple of the tile width tn.
    n_src_pad = _round_up(N, 128)
    tn = _choose_tile(n_src_pad, C, N)
    n_out_pad = _round_up(N, tn)
    n_tiles = n_out_pad // tn

    img_flat = jnp.pad(img_s.reshape(B, C, N), ((0, 0), (0, 0), (0, n_src_pad - N)))
    img_flat = img_flat.astype(jnp.bfloat16)            # MXU fast path; f32 accumulation

    depth_flat = jnp.pad(depth_s.reshape(B, 1, N), ((0, 0), (0, 0), (0, n_out_pad - N)))

    # Batch-independent output pixel grid (u = column, v = row), row-major flattened.
    u_host = jnp.tile(jnp.arange(Ws, dtype=jnp.float32), (Hs,))
    v_host = jnp.repeat(jnp.arange(Hs, dtype=jnp.float32), Ws)
    uv = jnp.pad(jnp.stack([u_host, v_host], axis=0), ((0, 0), (0, n_out_pad - N)))

    vmem_limit = int(min(max(_estimate_vmem_bytes(n_src_pad, tn, C), 32 * 1024 * 1024),
                         100 * 1024 * 1024))

    out = pl.pallas_call(
        functools.partial(warp_kernel, Hs=Hs, Ws=Ws, tn=tn, n_src_pad=n_src_pad),
        out_shape=jax.ShapeDtypeStruct((B, C, n_out_pad), jnp.float32),
        grid=(B, n_tiles),
        in_specs=[
            pl.BlockSpec(memory_space=pltpu.MemorySpace.SMEM),            # kparams (B, 6)
            pl.BlockSpec(memory_space=pltpu.MemorySpace.SMEM),            # T       (B, 3, 4)
            pl.BlockSpec((2, tn), lambda b, t: (0, t)),                   # uv grid (2, n_out_pad)
            pl.BlockSpec((1, 1, tn), lambda b, t: (b, 0, t)),             # depth (B, 1, n_out_pad)
            pl.BlockSpec((1, C, n_src_pad), lambda b, t: (b, 0, 0)),      # image, resident over t
        ],
        out_specs=pl.BlockSpec((1, C, tn), lambda b, t: (b, 0, t)),
        compiler_params=pltpu.CompilerParams(
            dimension_semantics=("parallel", "parallel"),
            vmem_limit_bytes=vmem_limit),
    )(kparams, T34, uv, depth_flat, img_flat)

    return out[:, :, :N].reshape(B, C, Hs, Ws)


if __name__ == "__main__":
    key = jax.random.PRNGKey(0)
    k_img, k_depth = jax.random.split(key, 2)

    B, C, H, W = 2, 4, 16, 16
    scale = 2

    fv_img_adjacent = jax.random.normal(k_img, (B, C, H, W), dtype=jnp.float32)
    depth_map = 1.0 + 4.0 * jax.random.uniform(k_depth, (B, 1, H, W), dtype=jnp.float32)

    # Pinhole intrinsics for the full-resolution image (B, 4, 4); module slices [:, :3, :3].
    K44 = jnp.array([[12.0, 0.0, 8.0, 0.0],
                     [0.0, 12.0, 8.0, 0.0],
                     [0.0, 0.0, 1.0, 0.0],
                     [0.0, 0.0, 0.0, 1.0]], dtype=jnp.float32)
    intrinsics = jnp.tile(K44[None], (B, 1, 1))

    # Camera-to-camera transform T (B, 3, 4): small rotation about y + small translation.
    ang = 0.05
    R = jnp.array([[jnp.cos(ang), 0.0, jnp.sin(ang)],
                   [0.0, 1.0, 0.0],
                   [-jnp.sin(ang), 0.0, jnp.cos(ang)]], dtype=jnp.float32)
    tvec = jnp.array([0.1, -0.05, 0.2], dtype=jnp.float32)
    T = jnp.tile(jnp.concatenate([R, tvec[:, None]], axis=1)[None], (B, 1, 1))

    warped = fv_to_fv_warper(fv_img_adjacent, depth_map, T, intrinsics, scale)
    warped = jax.block_until_ready(warped)

    assert warped.shape == (B, C, H // scale, W // scale), warped.shape
    assert bool(jnp.all(jnp.isfinite(warped)))
    print("KERNEL_OK")
</pallas_src>

<mosaic_0001>
module attributes {stable_mosaic.version = 11 : i64} {
  func.func @warp_kernel(%arg0: i32, %arg1: i32, %arg2: memref<2x6xf32, #tpu.memory_space<smem>>, %arg3: memref<2x3x4xf32, #tpu.memory_space<smem>>, %arg4: memref<2x128xf32, #tpu.memory_space<vmem>>, %arg5: memref<1x1x128xf32, #tpu.memory_space<vmem>>, %arg6: memref<1x4x128xbf16, #tpu.memory_space<vmem>>, %arg7: memref<1x4x128xf32, #tpu.memory_space<vmem>>) attributes {dimension_semantics = [#tpu.dimension_semantics<parallel>, #tpu.dimension_semantics<parallel>], iteration_bounds = array<i64: 2, 1>, scalar_prefetch = 0 : i64, scratch_operands = 0 : i64, tpu.core_type = #tpu.core_type<tc>, window_params = [{transform_indices = @transform_0, window_bounds = array<i64: 2, 6>}, {transform_indices = @transform_1, window_bounds = array<i64: 2, 3, 4>}, {transform_indices = @transform_2, window_bounds = array<i64: 2, 128>}, {transform_indices = @transform_3, window_bounds = array<i64: 1, 1, 128>}, {transform_indices = @transform_4, window_bounds = array<i64: 1, 4, 128>}, {transform_indices = @transform_5, window_bounds = array<i64: 1, 4, 128>}]} {
    %0 = arith.index_cast %arg0 : i32 to index
    %c0 = arith.constant 0 : index
    %1 = memref.load %arg2[%0, %c0] : memref<2x6xf32, #tpu.memory_space<smem>>
    %2 = arith.index_cast %arg0 : i32 to index
    %c1 = arith.constant 1 : index
    %3 = memref.load %arg2[%2, %c1] : memref<2x6xf32, #tpu.memory_space<smem>>
    %4 = arith.index_cast %arg0 : i32 to index
    %c2 = arith.constant 2 : index
    %5 = memref.load %arg2[%4, %c2] : memref<2x6xf32, #tpu.memory_space<smem>>
    %6 = arith.index_cast %arg0 : i32 to index
    %c3 = arith.constant 3 : index
    %7 = memref.load %arg2[%6, %c3] : memref<2x6xf32, #tpu.memory_space<smem>>
    %8 = arith.index_cast %arg0 : i32 to index
    %c4 = arith.constant 4 : index
    %9 = memref.load %arg2[%8, %c4] : memref<2x6xf32, #tpu.memory_space<smem>>
    %10 = arith.index_cast %arg0 : i32 to index
    %c5 = arith.constant 5 : index
    %11 = memref.load %arg2[%10, %c5] : memref<2x6xf32, #tpu.memory_space<smem>>
    %c0_0 = arith.constant 0 : index
    %c0_1 = arith.constant 0 : index
    %12 = vector.load %arg4[%c0_0, %c0_1] : memref<2x128xf32, #tpu.memory_space<vmem>>, vector<1x128xf32>
    %c1_2 = arith.constant 1 : index
    %c0_3 = arith.constant 0 : index
    %13 = vector.load %arg4[%c1_2, %c0_3] : memref<2x128xf32, #tpu.memory_space<vmem>>, vector<1x128xf32>
    %c0_4 = arith.constant 0 : index
    %c0_5 = arith.constant 0 : index
    %c0_6 = arith.constant 0 : index
    %14 = vector.load %arg5[%c0_4, %c0_5, %c0_6] : memref<1x1x128xf32, #tpu.memory_space<vmem>>, vector<1x1x128xf32>
    %15 = vector.shape_cast %14 : vector<1x1x128xf32> to vector<1x128xf32>
    %16 = vector.broadcast %5 : f32 to vector<1x128xf32>
    %17 = arith.subf %12, %16 : vector<1x128xf32>
    %18 = vector.broadcast %9 : f32 to vector<1x128xf32>
    %19 = arith.mulf %17, %18 : vector<1x128xf32>
    %20 = arith.mulf %15, %19 : vector<1x128xf32>
    %21 = vector.broadcast %7 : f32 to vector<1x128xf32>
    %22 = arith.subf %13, %21 : vector<1x128xf32>
    %23 = vector.broadcast %11 : f32 to vector<1x128xf32>
    %24 = arith.mulf %22, %23 : vector<1x128xf32>
    %25 = arith.mulf %15, %24 : vector<1x128xf32>
    %26 = arith.index_cast %arg0 : i32 to index
    %c0_7 = arith.constant 0 : index
    %c0_8 = arith.constant 0 : index
    %27 = memref.load %arg3[%26, %c0_7, %c0_8] : memref<2x3x4xf32, #tpu.memory_space<smem>>
    %28 = vector.broadcast %27 : f32 to vector<1x128xf32>
    %29 = arith.mulf %28, %20 : vector<1x128xf32>
    %30 = arith.index_cast %arg0 : i32 to index
    %c0_9 = arith.constant 0 : index
    %c1_10 = arith.constant 1 : index
    %31 = memref.load %arg3[%30, %c0_9, %c1_10] : memref<2x3x4xf32, #tpu.memory_space<smem>>
    %32 = vector.broadcast %31 : f32 to vector<1x128xf32>
    %33 = arith.mulf %32, %25 : vector<1x128xf32>
    %34 = arith.addf %29, %33 : vector<1x128xf32>
    %35 = arith.index_cast %arg0 : i32 to index
    %c0_11 = arith.constant 0 : index
    %c2_12 = arith.constant 2 : index
    %36 = memref.load %arg3[%35, %c0_11, %c2_12] : memref<2x3x4xf32, #tpu.memory_space<smem>>
    %37 = vector.broadcast %36 : f32 to vector<1x128xf32>
    %38 = arith.mulf %37, %15 : vector<1x128xf32>
    %39 = arith.addf %34, %38 : vector<1x128xf32>
    %40 = arith.index_cast %arg0 : i32 to index
    %c0_13 = arith.constant 0 : index
    %c3_14 = arith.constant 3 : index
    %41 = memref.load %arg3[%40, %c0_13, %c3_14] : memref<2x3x4xf32, #tpu.memory_space<smem>>
    %42 = vector.broadcast %41 : f32 to vector<1x128xf32>
    %43 = arith.addf %39, %42 : vector<1x128xf32>
    %44 = arith.index_cast %arg0 : i32 to index
    %c1_15 = arith.constant 1 : index
    %c0_16 = arith.constant 0 : index
    %45 = memref.load %arg3[%44, %c1_15, %c0_16] : memref<2x3x4xf32, #tpu.memory_space<smem>>
    %46 = vector.broadcast %45 : f32 to vector<1x128xf32>
    %47 = arith.mulf %46, %20 : vector<1x128xf32>
    %48 = arith.index_cast %arg0 : i32 to index
    %c1_17 = arith.constant 1 : index
    %c1_18 = arith.constant 1 : index
    %49 = memref.load %arg3[%48, %c1_17, %c1_18] : memref<2x3x4xf32, #tpu.memory_space<smem>>
    %50 = vector.broadcast %49 : f32 to vector<1x128xf32>
    %51 = arith.mulf %50, %25 : vector<1x128xf32>
    %52 = arith.addf %47, %51 : vector<1x128xf32>
    %53 = arith.index_cast %arg0 : i32 to index
    %c1_19 = arith.constant 1 : index
    %c2_20 = arith.constant 2 : index
    %54 = memref.load %arg3[%53, %c1_19, %c2_20] : memref<2x3x4xf32, #tpu.memory_space<smem>>
    %55 = vector.broadcast %54 : f32 to vector<1x128xf32>
    %56 = arith.mulf %55, %15 : vector<1x128xf32>
    %57 = arith.addf %52, %56 : vector<1x128xf32>
    %58 = arith.index_cast %arg0 : i32 to index
    %c1_21 = arith.constant 1 : index
    %c3_22 = arith.constant 3 : index
    %59 = memref.load %arg3[%58, %c1_21, %c3_22] : memref<2x3x4xf32, #tpu.memory_space<smem>>
    %60 = vector.broadcast %59 : f32 to vector<1x128xf32>
    %61 = arith.addf %57, %60 : vector<1x128xf32>
    %62 = arith.index_cast %arg0 : i32 to index
    %c2_23 = arith.constant 2 : index
    %c0_24 = arith.constant 0 : index
    %63 = memref.load %arg3[%62, %c2_23, %c0_24] : memref<2x3x4xf32, #tpu.memory_space<smem>>
    %64 = vector.broadcast %63 : f32 to vector<1x128xf32>
    %65 = arith.mulf %64, %20 : vector<1x128xf32>
    %66 = arith.index_cast %arg0 : i32 to index
    %c2_25 = arith.constant 2 : index
    %c1_26 = arith.constant 1 : index
    %67 = memref.load %arg3[%66, %c2_25, %c1_26] : memref<2x3x4xf32, #tpu.memory_space<smem>>
    %68 = vector.broadcast %67 : f32 to vector<1x128xf32>
    %69 = arith.mulf %68, %25 : vector<1x128xf32>
    %70 = arith.addf %65, %69 : vector<1x128xf32>
    %71 = arith.index_cast %arg0 : i32 to index
    %c2_27 = arith.constant 2 : index
    %c2_28 = arith.constant 2 : index
    %72 = memref.load %arg3[%71, %c2_27, %c2_28] : memref<2x3x4xf32, #tpu.memory_space<smem>>
    %73 = vector.broadcast %72 : f32 to vector<1x128xf32>
    %74 = arith.mulf %73, %15 : vector<1x128xf32>
    %75 = arith.addf %70, %74 : vector<1x128xf32>
    %76 = arith.index_cast %arg0 : i32 to index
    %c2_29 = arith.constant 2 : index
    %c3_30 = arith.constant 3 : index
    %77 = memref.load %arg3[%76, %c2_29, %c3_30] : memref<2x3x4xf32, #tpu.memory_space<smem>>
    %78 = vector.broadcast %77 : f32 to vector<1x128xf32>
    %79 = arith.addf %75, %78 : vector<1x128xf32>
    %cst = arith.constant 1.000000e-07 : f32
    %80 = vector.broadcast %cst : f32 to vector<1x128xf32>
    %81 = arith.addf %79, %80 : vector<1x128xf32>
    %82 = tpu.reciprocal %81 {approx = true} : vector<1x128xf32> -> vector<1x128xf32>
    %83 = vector.broadcast %1 : f32 to vector<1x128xf32>
    %84 = arith.mulf %83, %43 : vector<1x128xf32>
    %85 = vector.broadcast %5 : f32 to vector<1x128xf32>
    %86 = arith.mulf %85, %79 : vector<1x128xf32>
    %87 = arith.addf %84, %86 : vector<1x128xf32>
    %88 = arith.mulf %87, %82 : vector<1x128xf32>
    %89 = vector.broadcast %3 : f32 to vector<1x128xf32>
    %90 = arith.mulf %89, %61 : vector<1x128xf32>
    %91 = vector.broadcast %7 : f32 to vector<1x128xf32>
    %92 = arith.mulf %91, %79 : vector<1x128xf32>
    %93 = arith.addf %90, %92 : vector<1x128xf32>
    %94 = arith.mulf %93, %82 : vector<1x128xf32>
    %cst_31 = arith.constant 1.14285719 : f32
    %95 = vector.broadcast %cst_31 : f32 to vector<1x128xf32>
    %96 = arith.mulf %88, %95 : vector<1x128xf32>
    %cst_32 = arith.constant 5.000000e-01 : f32
    %97 = vector.broadcast %cst_32 : f32 to vector<1x128xf32>
    %98 = arith.subf %96, %97 : vector<1x128xf32>
    %cst_33 = arith.constant 1.14285719 : f32
    %99 = vector.broadcast %cst_33 : f32 to vector<1x128xf32>
    %100 = arith.mulf %94, %99 : vector<1x128xf32>
    %cst_34 = arith.constant 5.000000e-01 : f32
    %101 = vector.broadcast %cst_34 : f32 to vector<1x128xf32>
    %102 = arith.subf %100, %101 : vector<1x128xf32>
    %cst_35 = arith.constant -2.000000e+00 : f32
    %cst_36 = arith.constant 9.000000e+00 : f32
    %103 = vector.broadcast %cst_35 : f32 to vector<1x128xf32>
    %104 = arith.maximumf %103, %98 : vector<1x128xf32>
    %105 = vector.broadcast %cst_36 : f32 to vector<1x128xf32>
    %106 = arith.minimumf %105, %104 : vector<1x128xf32>
    %cst_37 = arith.constant -2.000000e+00 : f32
    %cst_38 = arith.constant 9.000000e+00 : f32
    %107 = vector.broadcast %cst_37 : f32 to vector<1x128xf32>
    %108 = arith.maximumf %107, %102 : vector<1x128xf32>
    %109 = vector.broadcast %cst_38 : f32 to vector<1x128xf32>
    %110 = arith.minimumf %109, %108 : vector<1x128xf32>
    %111 = math.floor %106 : vector<1x128xf32>
    %112 = math.floor %110 : vector<1x128xf32>
    %113 = arith.subf %106, %111 : vector<1x128xf32>
    %114 = arith.subf %110, %112 : vector<1x128xf32>
    %cst_39 = arith.constant 1.000000e+00 : f32
    %115 = vector.broadcast %cst_39 : f32 to vector<1x128xf32>
    %116 = arith.subf %115, %113 : vector<1x128xf32>
    %cst_40 = arith.constant 1.000000e+00 : f32
    %117 = vector.broadcast %cst_40 : f32 to vector<1x128xf32>
    %118 = arith.subf %117, %114 : vector<1x128xf32>
    %cst_41 = arith.constant 0.000000e+00 : f32
    %119 = vector.broadcast %cst_41 : f32 to vector<1x128xf32>
    %120 = arith.cmpf oge, %111, %119 : vector<1x128xf32>
    %cst_42 = arith.constant 7.000000e+00 : f32
    %121 = vector.broadcast %cst_42 : f32 to vector<1x128xf32>
    %122 = arith.cmpf ole, %111, %121 : vector<1x128xf32>
    %123 = arith.andi %120, %122 : vector<1x128xi1>
    %cst_43 = arith.constant -1.000000e+00 : f32
    %124 = vector.broadcast %cst_43 : f32 to vector<1x128xf32>
    %125 = arith.cmpf oge, %111, %124 : vector<1x128xf32>
    %cst_44 = arith.constant 6.000000e+00 : f32
    %126 = vector.broadcast %cst_44 : f32 to vector<1x128xf32>
    %127 = arith.cmpf ole, %111, %126 : vector<1x128xf32>
    %128 = arith.andi %125, %127 : vector<1x128xi1>
    %cst_45 = arith.constant 0.000000e+00 : f32
    %129 = vector.broadcast %cst_45 : f32 to vector<1x128xf32>
    %130 = arith.cmpf oge, %112, %129 : vector<1x128xf32>
    %cst_46 = arith.constant 7.000000e+00 : f32
    %131 = vector.broadcast %cst_46 : f32 to vector<1x128xf32>
    %132 = arith.cmpf ole, %112, %131 : vector<1x128xf32>
    %133 = arith.andi %130, %132 : vector<1x128xi1>
    %cst_47 = arith.constant -1.000000e+00 : f32
    %134 = vector.broadcast %cst_47 : f32 to vector<1x128xf32>
    %135 = arith.cmpf oge, %112, %134 : vector<1x128xf32>
    %cst_48 = arith.constant 6.000000e+00 : f32
    %136 = vector.broadcast %cst_48 : f32 to vector<1x128xf32>
    %137 = arith.cmpf ole, %112, %136 : vector<1x128xf32>
    %138 = arith.andi %135, %137 : vector<1x128xi1>
    %cst_49 = arith.constant 0.000000e+00 : f32
    %139 = vector.broadcast %cst_49 : f32 to vector<1x128xf32>
    %140 = arith.andi %123, %133 : vector<1x128xi1>
    %141 = arith.mulf %116, %118 : vector<1x128xf32>
    %142 = arith.select %140, %141, %139 : vector<1x128xi1>, vector<1x128xf32>
    %143 = arith.andi %128, %133 : vector<1x128xi1>
    %144 = arith.mulf %113, %118 : vector<1x128xf32>
    %145 = arith.select %143, %144, %139 : vector<1x128xi1>, vector<1x128xf32>
    %146 = arith.andi %123, %138 : vector<1x128xi1>
    %147 = arith.mulf %116, %114 : vector<1x128xf32>
    %148 = arith.select %146, %147, %139 : vector<1x128xi1>, vector<1x128xf32>
    %149 = arith.andi %128, %138 : vector<1x128xi1>
    %150 = arith.mulf %113, %114 : vector<1x128xf32>
    %151 = arith.select %149, %150, %139 : vector<1x128xi1>, vector<1x128xf32>
    %cst_50 = arith.constant 8.000000e+00 : f32
    %152 = vector.broadcast %cst_50 : f32 to vector<1x128xf32>
    %153 = arith.mulf %112, %152 : vector<1x128xf32>
    %154 = arith.addf %153, %111 : vector<1x128xf32>
    %155 = arith.fptosi %154 : vector<1x128xf32> to vector<1x128xi32>
    %156 = tpu.iota {dimensions = array<i32: 0>} : vector<128x128xi32>
    %157 = vector.broadcast %155 : vector<1x128xi32> to vector<128x128xi32>
    %158 = arith.cmpi eq, %156, %157 : vector<128x128xi32>
    %cst_51 = arith.constant 0.000000e+00 : f32
    %159 = vector.shape_cast %142 : vector<1x128xf32> to vector<1x128xf32>
    %160 = vector.broadcast %159 : vector<1x128xf32> to vector<128x128xf32>
    %161 = vector.broadcast %cst_51 : f32 to vector<128x128xf32>
    %162 = arith.select %158, %160, %161 : vector<128x128xi1>, vector<128x128xf32>
    %c1_i32 = arith.constant 1 : i32
    %163 = vector.broadcast %c1_i32 : i32 to vector<1x128xi32>
    %164 = arith.addi %155, %163 : vector<1x128xi32>
    %165 = vector.broadcast %164 : vector<1x128xi32> to vector<128x128xi32>
    %166 = arith.cmpi eq, %156, %165 : vector<128x128xi32>
    %cst_52 = arith.constant 0.000000e+00 : f32
    %167 = vector.shape_cast %145 : vector<1x128xf32> to vector<1x128xf32>
    %168 = vector.broadcast %167 : vector<1x128xf32> to vector<128x128xf32>
    %169 = vector.broadcast %cst_52 : f32 to vector<128x128xf32>
    %170 = arith.select %166, %168, %169 : vector<128x128xi1>, vector<128x128xf32>
    %171 = arith.addf %162, %170 : vector<128x128xf32>
    %c8_i32 = arith.constant 8 : i32
    %172 = vector.broadcast %c8_i32 : i32 to vector<1x128xi32>
    %173 = arith.addi %155, %172 : vector<1x128xi32>
    %174 = vector.broadcast %173 : vector<1x128xi32> to vector<128x128xi32>
    %175 = arith.cmpi eq, %156, %174 : vector<128x128xi32>
    %cst_53 = arith.constant 0.000000e+00 : f32
    %176 = vector.shape_cast %148 : vector<1x128xf32> to vector<1x128xf32>
    %177 = vector.broadcast %176 : vector<1x128xf32> to vector<128x128xf32>
    %178 = vector.broadcast %cst_53 : f32 to vector<128x128xf32>
    %179 = arith.select %175, %177, %178 : vector<128x128xi1>, vector<128x128xf32>
    %180 = arith.addf %171, %179 : vector<128x128xf32>
    %c9_i32 = arith.constant 9 : i32
    %181 = vector.broadcast %c9_i32 : i32 to vector<1x128xi32>
    %182 = arith.addi %155, %181 : vector<1x128xi32>
    %183 = vector.broadcast %182 : vector<1x128xi32> to vector<128x128xi32>
    %184 = arith.cmpi eq, %156, %183 : vector<128x128xi32>
    %cst_54 = arith.constant 0.000000e+00 : f32
    %185 = vector.shape_cast %151 : vector<1x128xf32> to vector<1x128xf32>
    %186 = vector.broadcast %185 : vector<1x128xf32> to vector<128x128xf32>
    %187 = vector.broadcast %cst_54 : f32 to vector<128x128xf32>
    %188 = arith.select %184, %186, %187 : vector<128x128xi1>, vector<128x128xf32>
    %189 = arith.addf %180, %188 : vector<128x128xf32>
    %c0_55 = arith.constant 0 : index
    %c0_56 = arith.constant 0 : index
    %c0_57 = arith.constant 0 : index
    %190 = vector.load %arg6[%c0_55, %c0_56, %c0_57] : memref<1x4x128xbf16, #tpu.memory_space<vmem>>, vector<1x4x128xbf16>
    %191 = vector.shape_cast %190 : vector<1x4x128xbf16> to vector<4x128xbf16>
    %192 = arith.truncf %189 : vector<128x128xf32> to vector<128x128xbf16>
    %cst_58 = arith.constant dense<0.000000e+00> : vector<4x128xf32>
    %193 = tpu.matmul %191, %192, %cst_58 {dimension_numbers = #tpu.dot_dimension_numbers<[1], [0], [0], [1], [0, 0, 1, 1], [], []>} : vector<4x128xbf16>, vector<128x128xbf16>, vector<4x128xf32> -> vector<4x128xf32>
    %c0_59 = arith.constant 0 : index
    %c0_60 = arith.constant 0 : index
    %c0_61 = arith.constant 0 : index
    %194 = vector.load %arg7[%c0_59, %c0_60, %c0_61] : memref<1x4x128xf32, #tpu.memory_space<vmem>>, vector<1x4x128xf32>
    %195 = vector.shape_cast %194 : vector<1x4x128xf32> to vector<4x128xf32>
    %196 = vector.shape_cast %193 : vector<4x128xf32> to vector<1x4x128xf32>
    tpu.vector_store %arg7[%c0_59, %c0_60, %c0_61], %196 {strides = array<i32>} : memref<1x4x128xf32, #tpu.memory_space<vmem>>, vector<1x4x128xf32>,
    return
  }
  func.func @transform_0(%arg0: i32, %arg1: i32) -> (i32, i32) {
    %c0_i32 = arith.constant 0 : i32
    %c0_i32_0 = arith.constant 0 : i32
    %c0_i32_1 = arith.constant 0 : i32
    return %c0_i32, %c0_i32_0 : i32, i32
  }
  func.func @transform_1(%arg0: i32, %arg1: i32) -> (i32, i32, i32) {
    %c0_i32 = arith.constant 0 : i32
    %c0_i32_0 = arith.constant 0 : i32
    %c0_i32_1 = arith.constant 0 : i32
    %c0_i32_2 = arith.constant 0 : i32
    return %c0_i32, %c0_i32_0, %c0_i32_1 : i32, i32, i32
  }
  func.func @transform_2(%arg0: i32, %arg1: i32) -> (i32, i32) {
    %c0_i32 = arith.constant 0 : i32
    %c0_i32_0 = arith.constant 0 : i32
    return %c0_i32, %arg1 : i32, i32
  }
  func.func @transform_3(%arg0: i32, %arg1: i32) -> (i32, i32, i32) {
    %c0_i32 = arith.constant 0 : i32
    %c0_i32_0 = arith.constant 0 : i32
    return %arg0, %c0_i32, %arg1 : i32, i32, i32
  }
  func.func @transform_4(%arg0: i32, %arg1: i32) -> (i32, i32, i32) {
    %c0_i32 = arith.constant 0 : i32
    %c0_i32_0 = arith.constant 0 : i32
    %c0_i32_1 = arith.constant 0 : i32
    return %arg0, %c0_i32, %c0_i32_0 : i32, i32, i32
  }
  func.func @transform_5(%arg0: i32, %arg1: i32) -> (i32, i32, i32) {
    %c0_i32 = arith.constant 0 : i32
    %c0_i32_0 = arith.constant 0 : i32
    return %arg0, %c0_i32, %arg1 : i32, i32, i32
  }
}

</mosaic_0001>

<bundles_post_ra>
// kernel: tpu_custom_call.1
= control target key start
LH: loop header
LB: loop body
LE: loop exit
PB: predicated region body
PF: predicated region fallthrough
CT: control target
= control target key end

     0   :  { %s1664_s0 = inlined_call_operand.vmem [shape: f32[2,6], index: 0, kind: input, shape index: {}]   ;;  %s1665_s1 = inlined_call_operand.vmem [shape: f32[2,3,4], index: 1, kind: input, shape index: {}]   ;;  %s1666_s2 = inlined_call_operand.vmem [shape: f32[2,128], index: 2, kind: input, shape index: {}]   ;;  %s1667_s3 = inlined_call_operand.vmem [shape: f32[2,1,128], index: 3, kind: input, shape index: {}]   ;;  %s1668_s4 = inlined_call_operand.vmem [shape: bf16[2,4,128], index: 4, kind: input, shape index: {}]   ;;  %s1669_s5 = inlined_call_operand.hbm [shape: f32[2,4,128], index: 5, kind: output, shape index: {}]  }
   0x1   :  { %1677 = sst [smem:[#allocation15_spill]] %s1664_s0 }
   0x2   :  { %1678 = sst [smem:[#allocation16_spill]] %s1665_s1 }
   0x3   :  { %1679 = sst [smem:[#allocation17_spill]] %s1666_s2 }
   0x4   :  { %1680 = sst [smem:[#allocation18_spill]] %s1667_s3 }
   0x5   :  { %10 = vsyncpa [#allocation4], 0 }
   0x6   :  { %11 = vsyncpa [#allocation6], 0 }
   0x7   :  { %12 = vsyncpa [#allocation3], 0 }
   0x8   :  { %14 = vsyncpa [#allocation3 + $0x1], 0  ;;  %s1157_s18 = smov 0   ;;  %s1159_s19 = smov 0  }
   0x9   :  { %s1161_s20 = smov 0   ;;  %s1163_s21 = smov 0  }
   0xa   :  { %s1165_s22 = smov 0   ;;  %s1167_s23 = smov 0  }
   0xb LB: > { %1681 = sst [smem:[#allocation11_spill]] %s1106_s20  ;;  %s859_s24 = sadd.s32 4294967295, %s1118_s23   ;;  %s1118_s23 = sphi %s1167_s23, %s20_s23   ;;  %s1114_s22 = sphi %s1165_s22, %s1709_s22   ;;  %s1110_s21 = sphi %s1163_s21, %s1708_s21   ;;  %s1106_s20 = sphi %s1161_s20, %s1707_s20   ;;  %s1102_s19 = sphi %s1159_s19, %s1711_s19   ;;  %s1098_s18 = sphi %s1157_s18, %s1710_s18  }
   0xc   : > { %1682 = sst [smem:[#allocation12_spill]] %s1114_s22  ;;  %s860_s25 = sadd.s32 4294967294, %s1118_s23  }
   0xd   : > { %s32_s26 = sadd.s32 1, %s1114_s22  ;;  %s163_s27 = sadd.s32 1, %s1106_s20 }
   0xe   : > { %p34_p0 = scmp.ge.s32.totalorder %s32_s26, 2  ;;  %p173_p1 = scmp.ne.s32.totalorder %s1106_s20, %s1102_s19 }
   0xf   : > { %p174_p2 = scmp.eq.s32.totalorder %s859_s24, 1  ;;  %p179_p3 = scmp.ne.s32.totalorder %s1102_s19, %s1098_s18 }
  0x10   : > { %s1713_s26 = smov (%p34_p0, %s32_s26), 0  ;;  %p180_p5 = scmp.eq.s32.totalorder %s860_s25, 1 }
  0x11   : > { %1683 = sst [smem:[#allocation13_spill]] %s1713_s26  ;;  %p1197_p4 = por %p174_p2, %p173_p1 }
  0x12   : > { %s158_s29 = ssub.s32 %s1114_s22, %s1713_s26  ;;  %p861_p6 = scmp.ge.s32.totalorder %s1118_s23, 1 }
  0x13   : > { %s1684_s28 = scalar_select %p1197_p4, 1, 0 }
  0x14   : > { %p161_p7 = scmp.eq.s32.totalorder %s158_s29, 0  ;;  %p1204_p8 = por %p180_p5, %p179_p3 }
  0x15   : > { %p187_p9 = scmp.lt.s32.totalorder %s1118_s23, 3  ;;  %p1216_p11 = scmp.eq.s32.totalorder %s859_s24, 0 }
  0x16   : > { %s1685_s30 = scalar_select %p1204_p8, 1, 0 }
  0x17   : > { %s1210_s6 = scalar_select %p161_p7, %s1106_s20, %s163_s27  }
  0x18   : > { %p1212_p10 = pnand %p861_p6, %p187_p9  ;;  %s1689_s0 = sld [smem:[#allocation15_spill]] }
  0x19   : > { %1686 = sst [smem:[#allocation14_spill]] %s1210_s6  ;;  %s1690_s1 = sld [smem:[#allocation16_spill]] }
  0x1a   : > { %s1687_s7 = scalar_select %p1212_p10, 1, 0 }
  0x1b   : > { %s1688_s8 = scalar_select %p1216_p11, 1, 0 }
  0x1c   : > { %p930_p12 = pneg %p1212_p10 }
  0x1e   : > { %s200_s11 = sshll.u32 %s1689_s0, 4  ;;  %p1230_p13 = pnand %p1216_p11, %p930_p12  ;;  %s201_s11 = int_to_ptr.vmem [resolvable:$true] %s200_s11 }
  0x1f   : > { %s210_s14 = sshll.u32 %s1690_s1, 4  ;;  %s1002_s16 = scalar_lea.vmem %s201_s11, 32  ;;  %s211_s14 = int_to_ptr.vmem [resolvable:$true] %s210_s14 }
  0x20   : > { %p1003_p0 = scmp.ne.s32.totalorder %s201_s11, %s1002_s16  ;;  %p1004_p1 = pneg %p1230_p13 }
  0x21   : > { %p1010_p5 = scmp.lt.s32.totalorder %s201_s11, %s201_s11  ;;  %p1011_p6 = scmp.lt.s32.totalorder %s1002_s16, %s1002_s16 }
  0x22   : > { %p1005_p2 = pnand %p1004_p1, %p1003_p0 }
  0x23   : > { %p1012_p7 = por %p1011_p6, %p1010_p5 }
  0x24   : > { %p1006_p3 = pneg %p1005_p2 }
  0x26   : > { %p1013_p9 = pnand %p1012_p7, %p1006_p3 }
  0x28   : > { %1016 = shalt.err (!%p1013_p9)
}
  0x29   : > { %s1120_s17 = smov [#allocation2]   ;;  %s1017_s24 = scalar_lea.vmem %s211_s14, 128 }
  0x2a   : > { %933 = dma.vmem_to_smem (!%p1230_p13), %s201_s11, 32, %s1120_s17, [#allocation4]  }
  0x2b   : > { %p1018_p12 = scmp.ne.s32.totalorder %s211_s14, %s1017_s24  ;;  %p1025_p11 = scmp.lt.s32.totalorder %s211_s14, %s211_s14 }
  0x2c   : > { %p1026_p10 = scmp.lt.s32.totalorder %s1017_s24, %s1017_s24 }
  0x2d   : > { %p1020_p8 = pnand %p1018_p12, %p1004_p1 }
  0x2e   : > { %p1027_p0 = por %p1026_p10, %p1025_p11 }
  0x2f   : > { %p1021_p4 = pneg %p1020_p8 }
  0x31   : > { %p1028_p2 = pnand %p1027_p0, %p1021_p4 }
  0x33   : > { %1031 = shalt.err (!%p1028_p2)
}
  0x34   : > { %s1121_s25 = smov [#allocation5]   ;;  %s1122_s27 = smov 64  }
  0x35   : > { %s1123_s29 = smov 4   ;;  %p1692_p3 = scmp.ne.s32.totalorder %s1687_s7, 0 }
  0x36   : > { %936 = dma.vmem_to_smem (!%p1230_p13), %s211_s14, 128, %s1121_s25, [#allocation6], %s1122_s27, %s1122_s27, %s1123_s29  }
  0x37   : > { %249 = sbr.rel (%p1692_p3) target bundleno = 418 (0x1a2), region = 40  ;;  %p1693_p5 = scmp.ne.s32.totalorder (!%p1692_p3), %s1688_s8, 0 }
  0x3e   : > { %1085 = dma.done.wait (%p1693_p5), [#allocation4], 32  }
  0x3f   : > { %1087 = vsyncadd (%p1693_p5), [#allocation4], 4294967264 }
  0x40   : > { %1089 = dma.done.wait (%p1693_p5), [#allocation6], 128  }
  0x41   : > { %1091 = vsyncadd (%p1693_p5), [#allocation6], 4294967168 }
  0x42   : > { %259 = sfence }
  0x43   : > { %p295_p4 = scmp.lt.s32.totalorder %s1110_s21, 1  ;;  %s1252_s7 = sshll.u32 %s1110_s21, 7  ;;  %v1124_v0 = vmov 0.0   ;;  %vm1125_vm0 = vmmov 0   ;;  %v441_v62 = vlaneseq }
  0x44   : > { %898 = vmatprep.subr.bf16.mxu0 %v1124_v0  ;;  %914 = vmatprep.mubr.msk.bf16.mxu0 %vm1125_vm0, %v1124_v0  ;;  %s310_s9 = sadd.s32 2, %s1252_s7  ;;  %s312_s11 = sadd.s32 3, %s1252_s7 }
  0x45   : > { %s1257_s8 = scalar_select %p295_p4, %s1110_s21, 1 }
  0x46   : > { %s1260_s10 = sld [smem:[#allocation2 + %s310_s9]]  ;;  %s314_s12 = sadd.s32 4, %s1252_s7 }
  0x47   : > { %s1264_s13 = sld [smem:[#allocation2 + %s312_s11]]  ;;  %s316_s15 = sadd.s32 5, %s1252_s7 }
  0x48   : > { %s315_s14 = sld [smem:[#allocation2 + %s314_s12]]  ;;  %s1271_s25 = sshll.u32 %s1110_s21, 9 }
  0x49   : > { %s317_s16 = sld [smem:[#allocation2 + %s316_s15]]  ;;  %s336_s27 = sadd.s32 1, %s1271_s25 }
  0x4a   : > { %s1694_s2 = sld [smem:[#allocation17_spill]]  ;;  %s341_s12 = sadd.s32 2, %s1271_s25 }
  0x4b   : > { %s1279_s11 = sld [smem:[#allocation5 + %s1271_s25]]  ;;  %s1287_s17 = sadd.s32 128, %s1271_s25 }
  0x4c   : > { %v321_v3 = vstv %s1260_s10  ;;  %s1284_s15 = sld [smem:[#allocation5 + %s336_s27]]  ;;  %s355_s9 = sadd.s32 1, %s1287_s17 }
  0x4d   : > { %s1695_s3 = sld [smem:[#allocation18_spill]]  ;;  %v326_v6 = vstv %s1264_s13  ;;  %s886_s24 = sadd.s32 256, %s1271_s25 }
  0x4e   : > { %v323_v5 = vstv %s315_s14  ;;  %s352_s29 = sld [smem:[#allocation5 + %s1287_s17]]  ;;  %s379_s22 = sadd.s32 2, %s886_s24 }
  0x4f   : > { %v328_v8 = vstv %s317_s16  ;;  %s1299_s27 = sld [smem:[#allocation5 + %s341_s12]]  ;;  %s346_s16 = sadd.s32 3, %s1271_s25 }
  0x50   : > { %v318_v1 = vld [vmem:[%s1694_s2] sm:$0x1]  ;;  %v319_v2 = vld [vmem:[%s1694_s2 + $0x1] sm:$0x1]  ;;  %s360_s2 = sadd.s32 2, %s1287_s17  ;;  %s356_s26 = sld [smem:[#allocation5 + %s355_s9]] }
  0x51   : > { %v322_v4 = vsub.f32 %v318_v1, %v321_v3  ;;  %v327_v7 = vsub.f32 %v319_v2, %v326_v6  ;;  %s1301_s0 = sld [smem:[#allocation5 + %s360_s2]]  ;;  %v334_v12 = vstv %s1279_s11  ;;  %s384_s12 = sadd.s32 3, %s886_s24 }
  0x52   : > { %s371_s14 = sld [smem:[#allocation5 + %s886_s24]]  ;;  %v338_v14 = vstv %s1284_s15  ;;  %s365_s2 = sadd.s32 3, %s1287_s17 }
  0x53   : > { %s300_s1 = scalar_lea.vmem %s1695_s3, %s1257_s8  ;;  %v324_v9 = vmul.f32 %v323_v5, %v322_v4  ;;  %v329_v11 = vmul.f32 %v328_v8, %v327_v7  ;;  %s374_s3 = sadd.s32 1, %s886_s24 }
  0x54   : > { %v320_v10 = vld [vmem:[%s300_s1] sm:$0x1]  ;;  %s375_s6 = sld [smem:[#allocation5 + %s374_s3]]  ;;  %v353_v15 = vstv %s352_s29  ;;  %s288_s13 = sand.u32 1, %s1102_s19  }
  0x55   : > { %s380_s20 = sld [smem:[#allocation5 + %s379_s22]]  ;;  %v325_v13 = vmul.f32 %v324_v9, %v320_v10  ;;  %v330_v16 = vmul.f32 %v329_v11, %v320_v10  ;;  %v343_v23 = vstv %s1299_s27  ;;  %s308_s22 = sadd.s32 1, %s1252_s7 }
  0x56   : > { %v357_v17 = vstv %s356_s26  ;;  %s385_s9 = sld [smem:[#allocation5 + %s384_s12]]  ;;  %v344_v31 = vmul.f32 %v343_v23, %v320_v10  ;;  %s869_s11 = sshll.u32 %s288_s13, 2 }
  0x57   : > { %v335_v18 = vmul.f32 %v334_v12, %v325_v13  ;;  %v339_v19 = vmul.f32 %v338_v14, %v330_v16  ;;  %v354_v20 = vmul.f32 %v353_v15, %v325_v13  ;;  %v358_v21 = vmul.f32 %v357_v17, %v330_v16  ;;  %s347_s1 = sld [smem:[#allocation5 + %s346_s16]]  ;;  %s290_s15 = scalar_lea.vmem [#allocation7], %s869_s11 }
  0x58   : > { %v372_v22 = vstv %s371_s14  ;;  %v362_v24 = vstv %s1301_s0  ;;  %s366_s3 = sld [smem:[#allocation5 + %s365_s2]]  ;;  %s742_s17 = sshll.u32 %s290_s15, 4  ;;  %s1614_s17 = int_to_ptr.vmem [resolvable:$true] %s742_s17 }
  0x59   : > { %v373_v25 = vmul.f32 %v372_v22, %v325_v13  ;;  %v340_v30 = vadd.f32 %v339_v19, %v335_v18  ;;  %v359_v32 = vadd.f32 %v358_v21, %v354_v20  ;;  %v363_v33 = vmul.f32 %v362_v24, %v320_v10  ;;  %s307_s26 = sld [smem:[#allocation2 + %s1252_s7]]  ;;  %s879_s29 = sshll.u32 %s1110_s21, 6 }
  0x5a   : > { %v376_v26 = vstv %s375_s6  ;;  %s309_s25 = sld [smem:[#allocation2 + %s308_s22]]  ;;  %s1619_s0 = scalar_lea.hbm %s1669_s5, %s879_s29 }
  0x5b   : > { %v381_v27 = vstv %s380_s20  ;;  %v377_v28 = vmul.f32 %v376_v26, %v330_v16  ;;  %v345_v37 = vadd.f32 %v344_v31, %v340_v30  ;;  %v364_v38 = vadd.f32 %v363_v33, %v359_v32  ;;  %s870_s20 = sshll.u32 %s1257_s8, 1  ;;  %s728_s24 = scalar_lea.sflag [#allocation3], %s288_s13 }
  0x5c   : > { %v382_v29 = vmul.f32 %v381_v27, %v320_v10  ;;  %v386_v35 = vstv %s385_s9  ;;  %s304_s10 = scalar_lea.vmem %s1668_s4, %s870_s20  ;;  %s1032_s14 = scalar_lea.vmem %s1614_s17, 64 }
  0x5d   : > { %v378_v34 = vadd.f32 %v377_v28, %v373_v25  ;;  %v348_v39 = vstv %s347_s1  ;;  %p1033_p8 = scmp.ne.s32.totalorder %s1614_s17, %s1032_s14  ;;  %p1704_p10 = scmp.ne.s32.totalorder %s1684_s28, 0 }
  0x5e   : > { %v367_v40 = vstv %s366_s3  ;;  %v349_v43 = vadd.f32 %v348_v39, %v345_v37  ;;  %s1126_s21 = smov [#allocation7]  }
  0x5f   : > { %v383_v36 = vadd.f32 %v382_v29, %v378_v34  ;;  %v368_v44 = vadd.f32 %v367_v40, %v364_v38  ;;  %v390_v45 = vstv %s307_s26  ;;  %p1034_p11 = pnand %p1033_p8, %p1704_p10  ;;  %s1036_s16 = sshll.u32 %s1126_s21, 4  ;;  %s1037_s16 = int_to_ptr.vmem [resolvable:$false] %s1036_s16 }
  0x60   : > { %v395_v46 = vstv %s309_s25  ;;  %v391_v47 = vmul.f32 %v390_v45, %v349_v43  ;;  %s1038_s12 = scalar_lea.vmem %s1037_s16, 128  ;;  %p1039_p1 = scmp.lt.s32.totalorder %s1614_s17, %s1037_s16 }
  0x61   : > { %v387_v41 = vadd.f32 %v386_v35, %v383_v36  ;;  %v396_v49 = vmul.f32 %v395_v46, %v368_v44  ;;  %p1035_p13 = pneg %p1034_p11  ;;  %p1040_p6 = scmp.lt.s32.totalorder %s1038_s12, %s1032_s14 }
  0x63   : > { %v388_v42 = vadd.f32 1e-07, %v387_v41  ;;  %v392_v48 = vmul.f32 %v387_v41, %v321_v3  ;;  %v397_v50 = vmul.f32 %v387_v41, %v326_v6  ;;  %v1316_v3 = vshrl.u32 %v441_v62, 7  ;;  %p1041_p7 = por %p1040_p6, %p1039_p1 }
  0x65   : > { %1000 = vrcp.f32 %v388_v42  ;;  %v393_v51 = vadd.f32 %v392_v48, %v391_v47  ;;  %v398_v52 = vadd.f32 %v397_v50, %v396_v49  ;;  %v443_v15 = vadd.s32 8, %v1316_v3  ;;  %p1042_p9 = pnand %p1041_p7, %p1035_p13 }
  0x66   : > { %v460_v16 = vsub.s32 0, %v1316_v3  ;;  %v1345_v21 = vadd.s32 16, %v1316_v3  ;;  %v1348_v22 = vadd.s32 24, %v1316_v3  ;;  %v1351_v23 = vadd.s32 32, %v1316_v3 }
  0x67   : > { %v1354_v24 = vadd.s32 40, %v1316_v3  ;;  %v1361_v27 = vadd.s32 48, %v1316_v3  ;;  %v1364_v28 = vadd.s32 56, %v1316_v3  ;;  %v1371_v29 = vadd.s32 64, %v1316_v3 }
  0x68   : > { %v1374_v30 = vadd.s32 72, %v1316_v3  ;;  %v1377_v31 = vadd.s32 80, %v1316_v3  ;;  %v1380_v32 = vadd.s32 88, %v1316_v3  ;;  %v1385_v38 = vadd.s32 96, %v1316_v3 }
  0x69   : > { %v1388_v39 = vadd.s32 104, %v1316_v3  ;;  %v1391_v40 = vadd.s32 112, %v1316_v3  ;;  %v1402_v48 = vadd.s32 120, %v1316_v3 }
  0x6f   : > { %v1001_v53 = vpop.eup %1000 }
  0x70   : > { %v394_v54 = vmul.f32 %v1001_v53, %v393_v51  ;;  %v399_v55 = vmul.f32 %v1001_v53, %v398_v52 }
  0x72   : > { %v400_v56 = vmul.f32 1.1428572, %v394_v54  ;;  %v402_v57 = vmul.f32 1.1428572, %v399_v55 }
  0x74   : > { %v876_v58 = vadd.f32 -0.5, %v400_v56  ;;  %v877_v59 = vadd.f32 -0.5, %v402_v57 }
  0x76   : > { %v404_v60 = vmax.f32 %v876_v58, -2.0  ;;  %v406_v61 = vmax.f32 %v877_v59, -2.0 }
  0x78   : > { %v405_v63 = vmin.f32 %v404_v60, 9.0  ;;  %v407_v1 = vmin.f32 %v406_v61, 9.0 }
  0x7a   : > { %v408_v2 = vfloor.f32 %v405_v63  ;;  %v409_v4 = vfloor.f32 %v407_v1 }
  0x7c   : > { %v410_v5 = vsub.f32 %v405_v63, %v408_v2  ;;  %v411_v6 = vsub.f32 %v407_v1, %v409_v4  ;;  %vm414_vm1 = vcmp.ge.f32.partialorder %v408_v2, 0.0  ;;  %vm415_vm2 = vcmp.le.f32.partialorder %v408_v2, 7.0 }
  0x7d   : > { %vm1318_vm3 = vmand %vm414_vm1, %vm415_vm2  ;;  %vm417_vm4 = vcmp.ge.f32.partialorder %v408_v2, -1.0  ;;  %vm418_vm5 = vcmp.le.f32.partialorder %v408_v2, 6.0  ;;  %vm420_vm6 = vcmp.ge.f32.partialorder %v409_v4, 0.0  ;;  %vm421_vm7 = vcmp.le.f32.partialorder %v409_v4, 7.0 }
  0x7e   : > { %v412_v8 = vsub.f32 1.0, %v410_v5  ;;  %v413_v9 = vsub.f32 1.0, %v411_v6  ;;  %vm1322_vm8 = vmand %vm417_vm4, %vm418_vm5  ;;  %vm423_vm9 = vcmp.ge.f32.partialorder %v409_v4, -1.0  ;;  %vm424_vm10 = vcmp.le.f32.partialorder %v409_v4, 6.0 }
  0x7f   : > { %vm1326_vm11 = vmand %vm420_vm6, %vm421_vm7  ;;  %v438_v12 = vmul.f32 8.0, %v409_v4  ;;  %v436_v19 = vmul.f32 %v411_v6, %v410_v5 }
  0x80   : > { %vm1330_vm12 = vmand %vm423_vm9, %vm424_vm10  ;;  %v427_v14 = vmul.f32 %v413_v9, %v412_v8  ;;  %v430_v17 = vmul.f32 %v413_v9, %v410_v5  ;;  %v433_v18 = vmul.f32 %v412_v8, %v411_v6 }
  0x81   : > { %vm426_vm13 = vmand %vm1318_vm3, %vm1326_vm11  ;;  %v439_v20 = vadd.f32 %v438_v12, %v408_v2 }
  0x82   : > { %vm429_vm14 = vmand %vm1322_vm8, %vm1326_vm11  ;;  %v428_v25 = vsel %vm426_vm13, %v427_v14, 0.0 }
  0x83   : > { %vm432_vm15 = vmand %vm1318_vm3, %vm1330_vm12  ;;  %v918_v26 = vtrunc.f32 %v439_v20  ;;  %v431_v33 = vsel %vm429_vm14, %v430_v17, 0.0  ;;  %v1382_v37 = vrot.slane %v428_v25, %v460_v16 }
  0x84   : > { %vm435_vm0 = vmand %vm1322_vm8, %vm1330_vm12  ;;  %v434_v34 = vsel %vm432_vm15, %v433_v18, 0.0  ;;  %v1395_v45 = vrot.slane %v431_v33, %v460_v16 }
  0x85   : > { %v437_v35 = vsel %vm435_vm0, %v436_v19, 0.0  ;;  %v919_v36 = vcvt.f32.s32 %v918_v26  ;;  %v1397_v46 = vrot.slane %v434_v34, %v460_v16 }
  0x86   : > { %v1399_v47 = vrot.slane %v437_v35, %v460_v16 }
  0x87   : > { %v1393_v41 = vrot.slane %v919_v36, %v460_v16  ;;  %v500_v42 = vadd.s32 1, %v919_v36  ;;  %v559_v43 = vadd.s32 8, %v919_v36  ;;  %v618_v44 = vadd.s32 9, %v919_v36 }
  0x89   : > { %vm462_vm1 = vcmp.eq.s32.totalorder %v1316_v3, %v1393_v41  ;;  %vm463_vm2 = vcmp.eq.s32.totalorder %v443_v15, %v1393_v41  ;;  %v1407_v49 = vrot.slane %v500_v42, %v460_v16  ;;  %v1409_v50 = vrot.slane %v559_v43, %v460_v16 }
  0x8a   : > { %v484_v51 = vsel %vm462_vm1, %v1382_v37, 0.0  ;;  %v485_v52 = vsel %vm463_vm2, %v1382_v37, 0.0  ;;  %v1413_v53 = vrot.slane %v618_v44, %v460_v16  ;;  %vm464_vm3 = vcmp.eq.s32.totalorder %v1345_v21, %v1393_v41 }
  0x8b   : > { %vm505_vm4 = vcmp.eq.s32.totalorder %v1316_v3, %v1407_v49  ;;  %vm506_vm5 = vcmp.eq.s32.totalorder %v443_v15, %v1407_v49  ;;  %vm564_vm6 = vcmp.eq.s32.totalorder %v1316_v3, %v1409_v50  ;;  %vm565_vm7 = vcmp.eq.s32.totalorder %v443_v15, %v1409_v50 }
  0x8c   : > { %v527_v54 = vsel %vm505_vm4, %v1395_v45, 0.0  ;;  %v528_v55 = vsel %vm506_vm5, %v1395_v45, 0.0  ;;  %v586_v56 = vsel %vm564_vm6, %v1397_v46, 0.0  ;;  %v587_v57 = vsel %vm565_vm7, %v1397_v46, 0.0 }
  0x8d   : > { %v543_v58 = vadd.f32 %v527_v54, %v484_v51  ;;  %v544_v59 = vadd.f32 %v528_v55, %v485_v52  ;;  %vm623_vm8 = vcmp.eq.s32.totalorder %v1316_v3, %v1413_v53  ;;  %vm624_vm9 = vcmp.eq.s32.totalorder %v443_v15, %v1413_v53 }
  0x8e   : > { %v645_v60 = vsel %vm623_vm8, %v1399_v47, 0.0  ;;  %v646_v61 = vsel %vm624_vm9, %v1399_v47, 0.0  ;;  %vm465_vm10 = vcmp.eq.s32.totalorder %v1348_v22, %v1393_v41  ;;  %v486_v62 = vsel %vm464_vm3, %v1382_v37, 0.0 }
  0x8f   : > { %v602_v63 = vadd.f32 %v586_v56, %v543_v58  ;;  %v603_v1 = vadd.f32 %v587_v57, %v544_v59  ;;  %v487_v2 = vsel %vm465_vm10, %v1382_v37, 0.0  ;;  %vm507_vm11 = vcmp.eq.s32.totalorder %v1345_v21, %v1407_v49 }
  0x90   : > { %vm508_vm12 = vcmp.eq.s32.totalorder %v1348_v22, %v1407_v49  ;;  %v529_v4 = vsel %vm507_vm11, %v1395_v45, 0.0  ;;  %vm566_vm13 = vcmp.eq.s32.totalorder %v1345_v21, %v1409_v50  ;;  %vm567_vm14 = vcmp.eq.s32.totalorder %v1348_v22, %v1409_v50 }
  0x91   : > { %v661_v3 = vadd.f32 %v645_v60, %v602_v63  ;;  %v662_v5 = vadd.f32 %v646_v61, %v603_v1  ;;  %v530_v6 = vsel %vm508_vm12, %v1395_v45, 0.0  ;;  %v545_v7 = vadd.f32 %v529_v4, %v486_v62 }
  0x92   : > { %v546_v8 = vadd.f32 %v530_v6, %v487_v2  ;;  %v588_v9 = vsel %vm566_vm13, %v1397_v46, 0.0  ;;  %v589_v10 = vsel %vm567_vm14, %v1397_v46, 0.0  ;;  %vm625_vm15 = vcmp.eq.s32.totalorder %v1345_v21, %v1413_v53 }
  0x93   : > { %v678_v11 = vpack.c.bf16 %v662_v5, %v661_v3  ;;  %v604_v12 = vadd.f32 %v588_v9, %v545_v7  ;;  %vm626_vm0 = vcmp.eq.s32.totalorder %v1348_v22, %v1413_v53  ;;  %v647_v13 = vsel %vm625_vm15, %v1399_v47, 0.0 }
  0x94   : > { %v605_v14 = vadd.f32 %v589_v10, %v546_v8  ;;  %v648_v15 = vsel %vm626_vm0, %v1399_v47, 0.0  ;;  %vm466_vm1 = vcmp.eq.s32.totalorder %v1351_v23, %v1393_v41  ;;  %vm467_vm2 = vcmp.eq.s32.totalorder %v1354_v24, %v1393_v41 }
  0x95   : > { %899 = vmatpush3.bf16.msra.mxu0 %v678_v11  ;;  %v663_v16 = vadd.f32 %v647_v13, %v604_v12  ;;  %v488_v17 = vsel %vm466_vm1, %v1382_v37, 0.0  ;;  %v489_v18 = vsel %vm467_vm2, %v1382_v37, 0.0  ;;  %vm509_vm3 = vcmp.eq.s32.totalorder %v1351_v23, %v1407_v49 }
  0x96   : > { %900 = vmatprep.subr.bf16.mxu0 %v1124_v0  ;;  %v664_v19 = vadd.f32 %v648_v15, %v605_v14  ;;  %vm510_vm4 = vcmp.eq.s32.totalorder %v1354_v24, %v1407_v49  ;;  %v531_v20 = vsel %vm509_vm3, %v1395_v45, 0.0  ;;  %vm568_vm5 = vcmp.eq.s32.totalorder %v1351_v23, %v1409_v50 }
  0x97   : > { %v532_v21 = vsel %vm510_vm4, %v1395_v45, 0.0  ;;  %v547_v22 = vadd.f32 %v531_v20, %v488_v17  ;;  %vm569_vm6 = vcmp.eq.s32.totalorder %v1354_v24, %v1409_v50  ;;  %v590_v25 = vsel %vm568_vm5, %v1397_v46, 0.0 }
  0x98   : > { %v679_v26 = vpack.c.bf16 %v664_v19, %v663_v16  ;;  %v548_v33 = vadd.f32 %v532_v21, %v489_v18  ;;  %v591_v34 = vsel %vm569_vm6, %v1397_v46, 0.0  ;;  %vm627_vm7 = vcmp.eq.s32.totalorder %v1351_v23, %v1413_v53 }
  0x99   : > { %v606_v35 = vadd.f32 %v590_v25, %v547_v22  ;;  %vm628_vm8 = vcmp.eq.s32.totalorder %v1354_v24, %v1413_v53  ;;  %v649_v36 = vsel %vm627_vm7, %v1399_v47, 0.0  ;;  %vm468_vm9 = vcmp.eq.s32.totalorder %v1361_v27, %v1393_v41 }
  0x9a   : > { %901 = vmatpush3.bf16.msra.mxu0 %v679_v26  ;;  %v607_v42 = vadd.f32 %v591_v34, %v548_v33  ;;  %v650_v43 = vsel %vm628_vm8, %v1399_v47, 0.0  ;;  %vm469_vm10 = vcmp.eq.s32.totalorder %v1364_v28, %v1393_v41  ;;  %v490_v44 = vsel %vm468_vm9, %v1382_v37, 0.0 }
  0x9b   : > { %902 = vmatprep.subr.bf16.mxu0 %v1124_v0  ;;  %v665_v23 = vadd.f32 %v649_v36, %v606_v35  ;;  %v491_v51 = vsel %vm469_vm10, %v1382_v37, 0.0  ;;  %vm511_vm11 = vcmp.eq.s32.totalorder %v1361_v27, %v1407_v49  ;;  %vm512_vm12 = vcmp.eq.s32.totalorder %v1364_v28, %v1407_v49 }
  0x9c   : > { %v666_v24 = vadd.f32 %v650_v43, %v607_v42  ;;  %v533_v52 = vsel %vm511_vm11, %v1395_v45, 0.0  ;;  %v534_v54 = vsel %vm512_vm12, %v1395_v45, 0.0  ;;  %vm570_vm13 = vcmp.eq.s32.totalorder %v1361_v27, %v1409_v50 }
  0x9d   : > { %v549_v55 = vadd.f32 %v533_v52, %v490_v44  ;;  %v550_v56 = vadd.f32 %v534_v54, %v491_v51  ;;  %vm571_vm14 = vcmp.eq.s32.totalorder %v1364_v28, %v1409_v50  ;;  %v592_v57 = vsel %vm570_vm13, %v1397_v46, 0.0 }
  0x9e   : > { %v680_v58 = vpack.c.bf16 %v666_v24, %v665_v23  ;;  %v593_v59 = vsel %vm571_vm14, %v1397_v46, 0.0  ;;  %vm629_vm15 = vcmp.eq.s32.totalorder %v1361_v27, %v1413_v53  ;;  %vm630_vm0 = vcmp.eq.s32.totalorder %v1364_v28, %v1413_v53 }
  0x9f   : > { %v608_v60 = vadd.f32 %v592_v57, %v549_v55  ;;  %v609_v61 = vadd.f32 %v593_v59, %v550_v56  ;;  %v651_v62 = vsel %vm629_vm15, %v1399_v47, 0.0  ;;  %v652_v63 = vsel %vm630_vm0, %v1399_v47, 0.0 }
  0xa0   : > { %903 = vmatpush3.bf16.msra.mxu0 %v680_v58  ;;  %vm470_vm1 = vcmp.eq.s32.totalorder %v1371_v29, %v1393_v41  ;;  %vm471_vm2 = vcmp.eq.s32.totalorder %v1374_v30, %v1393_v41  ;;  %vm513_vm3 = vcmp.eq.s32.totalorder %v1371_v29, %v1407_v49  ;;  %vm514_vm4 = vcmp.eq.s32.totalorder %v1374_v30, %v1407_v49 }
  0xa1   : > { %904 = vmatprep.subr.bf16.mxu0 %v1124_v0  ;;  %v667_v27 = vadd.f32 %v651_v62, %v608_v60  ;;  %v668_v28 = vadd.f32 %v652_v63, %v609_v61  ;;  %v492_v1 = vsel %vm470_vm1, %v1382_v37, 0.0  ;;  %v493_v2 = vsel %vm471_vm2, %v1382_v37, 0.0 }
  0xa2   : > { %v535_v4 = vsel %vm513_vm3, %v1395_v45, 0.0  ;;  %v536_v3 = vsel %vm514_vm4, %v1395_v45, 0.0  ;;  %vm572_vm5 = vcmp.eq.s32.totalorder %v1371_v29, %v1409_v50  ;;  %vm573_vm6 = vcmp.eq.s32.totalorder %v1374_v30, %v1409_v50 }
  0xa3   : > { %v681_v5 = vpack.c.bf16 %v668_v28, %v667_v27  ;;  %v551_v6 = vadd.f32 %v535_v4, %v492_v1  ;;  %v552_v7 = vadd.f32 %v536_v3, %v493_v2  ;;  %v594_v8 = vsel %vm572_vm5, %v1397_v46, 0.0 }
  0xa4   : > { %v595_v9 = vsel %vm573_vm6, %v1397_v46, 0.0  ;;  %vm631_vm7 = vcmp.eq.s32.totalorder %v1371_v29, %v1413_v53  ;;  %vm632_vm8 = vcmp.eq.s32.totalorder %v1374_v30, %v1413_v53  ;;  %vm472_vm9 = vcmp.eq.s32.totalorder %v1377_v31, %v1393_v41 }
  0xa5   : > { %905 = vmatpush3.bf16.msra.mxu0 %v681_v5  ;;  %v610_v10 = vadd.f32 %v594_v8, %v551_v6  ;;  %v611_v11 = vadd.f32 %v595_v9, %v552_v7  ;;  %v653_v12 = vsel %vm631_vm7, %v1399_v47, 0.0  ;;  %v654_v13 = vsel %vm632_vm8, %v1399_v47, 0.0 }
  0xa6   : > { %906 = vmatprep.subr.bf16.mxu0 %v1124_v0  ;;  %vm473_vm10 = vcmp.eq.s32.totalorder %v1380_v32, %v1393_v41  ;;  %v494_v29 = vsel %vm472_vm9, %v1382_v37, 0.0  ;;  %vm515_vm11 = vcmp.eq.s32.totalorder %v1377_v31, %v1407_v49  ;;  %vm516_vm12 = vcmp.eq.s32.totalorder %v1380_v32, %v1407_v49 }
  0xa7   : > { %v669_v30 = vadd.f32 %v653_v12, %v610_v10  ;;  %v670_v14 = vadd.f32 %v654_v13, %v611_v11  ;;  %v495_v15 = vsel %vm473_vm10, %v1382_v37, 0.0  ;;  %v537_v16 = vsel %vm515_vm11, %v1395_v45, 0.0 }
  0xa8   : > { %v538_v17 = vsel %vm516_vm12, %v1395_v45, 0.0  ;;  %v553_v18 = vadd.f32 %v537_v16, %v494_v29  ;;  %vm574_vm13 = vcmp.eq.s32.totalorder %v1377_v31, %v1409_v50  ;;  %vm575_vm14 = vcmp.eq.s32.totalorder %v1380_v32, %v1409_v50 }
  0xa9   : > { %v682_v19 = vpack.c.bf16 %v670_v14, %v669_v30  ;;  %v554_v20 = vadd.f32 %v538_v17, %v495_v15  ;;  %v596_v21 = vsel %vm574_vm13, %v1397_v46, 0.0  ;;  %v597_v22 = vsel %vm575_vm14, %v1397_v46, 0.0 }
  0xaa   : > { %v612_v25 = vadd.f32 %v596_v21, %v553_v18  ;;  %vm633_vm15 = vcmp.eq.s32.totalorder %v1377_v31, %v1413_v53  ;;  %vm634_vm0 = vcmp.eq.s32.totalorder %v1380_v32, %v1413_v53  ;;  %vm474_vm1 = vcmp.eq.s32.totalorder %v1385_v38, %v1393_v41 }
  0xab   : > { %907 = vmatpush3.bf16.msra.mxu0 %v682_v19  ;;  %v613_v26 = vadd.f32 %v597_v22, %v554_v20  ;;  %v655_v33 = vsel %vm633_vm15, %v1399_v47, 0.0  ;;  %v656_v34 = vsel %vm634_vm0, %v1399_v47, 0.0  ;;  %vm475_vm2 = vcmp.eq.s32.totalorder %v1388_v39, %v1393_v41 }
  0xac   : > { %908 = vmatprep.subr.bf16.mxu0 %v1124_v0  ;;  %v671_v35 = vadd.f32 %v655_v33, %v612_v25  ;;  %v496_v31 = vsel %vm474_vm1, %v1382_v37, 0.0  ;;  %v497_v36 = vsel %vm475_vm2, %v1382_v37, 0.0  ;;  %vm517_vm3 = vcmp.eq.s32.totalorder %v1385_v38, %v1407_v49 }
  0xad   : > { %v672_v32 = vadd.f32 %v656_v34, %v613_v26  ;;  %vm518_vm4 = vcmp.eq.s32.totalorder %v1388_v39, %v1407_v49  ;;  %v539_v42 = vsel %vm517_vm3, %v1395_v45, 0.0  ;;  %vm576_vm5 = vcmp.eq.s32.totalorder %v1385_v38, %v1409_v50 }
  0xae   : > { %v540_v43 = vsel %vm518_vm4, %v1395_v45, 0.0  ;;  %v555_v44 = vadd.f32 %v539_v42, %v496_v31  ;;  %vm577_vm6 = vcmp.eq.s32.totalorder %v1388_v39, %v1409_v50  ;;  %v598_v23 = vsel %vm576_vm5, %v1397_v46, 0.0 }
  0xaf   : > { %v683_v51 = vpack.c.bf16 %v672_v32, %v671_v35  ;;  %v556_v24 = vadd.f32 %v540_v43, %v497_v36  ;;  %v599_v52 = vsel %vm577_vm6, %v1397_v46, 0.0  ;;  %vm635_vm7 = vcmp.eq.s32.totalorder %v1385_v38, %v1413_v53 }
  0xb0   : > { %v614_v54 = vadd.f32 %v598_v23, %v555_v44  ;;  %vm636_vm8 = vcmp.eq.s32.totalorder %v1388_v39, %v1413_v53  ;;  %v657_v55 = vsel %vm635_vm7, %v1399_v47, 0.0  ;;  %vm476_vm9 = vcmp.eq.s32.totalorder %v1391_v40, %v1393_v41 }
  0xb1   : > { %909 = vmatpush3.bf16.msra.mxu0 %v683_v51  ;;  %v615_v56 = vadd.f32 %v599_v52, %v556_v24  ;;  %v658_v57 = vsel %vm636_vm8, %v1399_v47, 0.0  ;;  %vm477_vm10 = vcmp.eq.s32.totalorder %v1402_v48, %v1393_v41  ;;  %v498_v58 = vsel %vm476_vm9, %v1382_v37, 0.0 }
  0xb2   : > { %910 = vmatprep.subr.bf16.mxu0 %v1124_v0  ;;  %v673_v38 = vadd.f32 %v657_v55, %v614_v54  ;;  %v499_v59 = vsel %vm477_vm10, %v1382_v37, 0.0  ;;  %vm519_vm11 = vcmp.eq.s32.totalorder %v1391_v40, %v1407_v49  ;;  %vm520_vm12 = vcmp.eq.s32.totalorder %v1402_v48, %v1407_v49 }
  0xb3   : > { %v674_v39 = vadd.f32 %v658_v57, %v615_v56  ;;  %v541_v60 = vsel %vm519_vm11, %v1395_v45, 0.0  ;;  %v542_v61 = vsel %vm520_vm12, %v1395_v45, 0.0  ;;  %vm578_vm13 = vcmp.eq.s32.totalorder %v1391_v40, %v1409_v50 }
  0xb4   : > { %v557_v41 = vadd.f32 %v541_v60, %v498_v58  ;;  %v558_v62 = vadd.f32 %v542_v61, %v499_v59  ;;  %vm579_vm14 = vcmp.eq.s32.totalorder %v1402_v48, %v1409_v50  ;;  %v600_v37 = vsel %vm578_vm13, %v1397_v46, 0.0 }
  0xb5   : > { %v684_v63 = vpack.c.bf16 %v674_v39, %v673_v38  ;;  %v601_v27 = vsel %vm579_vm14, %v1397_v46, 0.0  ;;  %vm637_vm15 = vcmp.eq.s32.totalorder %v1391_v40, %v1413_v53  ;;  %vm638_vm0 = vcmp.eq.s32.totalorder %v1402_v48, %v1413_v53  ;;  %v677_v48 = vld [vmem:[%s304_s10] sm:$0x3] }
  0xb6   : > { %v616_v45 = vadd.f32 %v600_v37, %v557_v41  ;;  %v617_v49 = vadd.f32 %v601_v27, %v558_v62  ;;  %v659_v28 = vsel %vm637_vm15, %v1399_v47, 0.0  ;;  %v660_v1 = vsel %vm638_vm0, %v1399_v47, 0.0 }
  0xb7   : > { %911 = vmatpush3.bf16.msra.mxu0 %v684_v63 }
  0xb8   : > { %912 = vmatprep.subr.bf16.mxu0 %v1124_v0  ;;  %v675_v50 = vadd.f32 %v659_v28, %v616_v45  ;;  %v676_v46 = vadd.f32 %v660_v1, %v617_v49 }
  0xba   : > { %v685_v40 = vpack.c.bf16 %v676_v46, %v675_v50 }
  0xbc   : > { %913 = vmatpush3.bf16.msra.mxu0 %v685_v40 }
  0xbf   : > { %915 = vmatmul.mubr.bf16.vlgmr.msra.gmra.mrb[0].mxu0 %v677_v48 }
 0x192   : > { %v720_v0 = vpop.f32.mrb[0].mxu0 }
 0x193   : > { %726 = vst [vmem:[%s290_s15] sm:$0xf] %v720_v0  ;;  %v916_v47 = vpop.f32.mrb[1].mxu0 }
 0x194   : > { %v723_v53 = vpop.f32.mrb[2].mxu0 }
 0x195   : > { %1045 = shalt.err (!%p1042_p9)
}
 0x196   : > { %s1046_s2 = scalar_lea.hbm %s1619_s0, 64  ;;  %s1050_s3 = scalar_lea.hbm %s1669_s5, 128 }
 0x197   : > { %p1047_p12 = scmp.ne.s32.totalorder %s1619_s0, %s1046_s2  ;;  %p1051_p3 = scmp.lt.u32.totalorder %s1619_s0, %s1669_s5 }
 0x198   : > { %p1052_p5 = scmp.lt.u32.totalorder %s1050_s3, %s1046_s2  ;;  %p1054_p8 = scmp.lt.u32.totalorder %s1046_s2, %s1619_s0 }
 0x199   : > { %p1048_p0 = pnand %p1047_p12, %p1704_p10 }
 0x19a   : > { %p1053_p4 = por %p1052_p5, %p1051_p3 }
 0x19b   : > { %p1049_p2 = pneg %p1048_p0 }
 0x19c   : > { %p1055_p11 = por %p1054_p8, %p1053_p4 }
 0x19e   : > { %p1056_p13 = pnand %p1055_p11, %p1049_p2 }
 0x1a0   : > { %1059 = shalt.err (!%p1056_p13)
}
 0x1a1   : > { %928 = dma.vmem_to_hbm [thread:$0]  (%p1704_p10), %s1614_s17, 64, %s1619_s0, %s728_s24   ;;  %v917_v2 = vpop.f32.mrb[3].mxu0 }
 0x1a2 PF: > { %p945_p1 = scmp.ge.s32.totalorder %s1118_s23, 2  ;;  %s754_s25 = sand.u32 1, %s1098_s18  }
 0x1a3   : > { %p1705_p6 = scmp.ne.s32.totalorder %s1685_s30, 0  ;;  %s755_s20 = scalar_lea.sflag [#allocation3], %s754_s25 }
 0x1a5   : > { %p938_p7 = pnand %p945_p1, %p1705_p6 }
 0x1a7   : > { %1093 = dma.done.wait (!%p938_p7), %s755_s20, 64  }
 0x1a8   : > { %1095 = vsyncadd (!%p938_p7), %s755_s20, 4294967232  ;;  %s20_s23 = sadd.s32 1, %s1118_s23   ;;  %s1706_s28 = sld [smem:[#allocation11_spill]] }
 0x1a9   : > { %p17_p9 = scmp.ge.s32.totalorder %s20_s23, 4   ;;  %s1707_s20 = sld [smem:[#allocation14_spill]] }
 0x1aa   : > { %s1708_s21 = sld [smem:[#allocation12_spill]]  ;;  %s1709_s22 = sld [smem:[#allocation13_spill]] }
 0x1ab   : > { %s1710_s18 = smov %s1102_s19  ;;  %19 = sbr.rel (!%p17_p9) target bundleno = 11 (0xb), region = 90 }
 0x1ae   : > { %s1711_s19 = smov %s1706_s28 }
 0x1b2   :  { %760 = vsyncpa [#allocation3], 1 }
 0x1b3   :  { %762 = vsyncpa [#allocation3 + $0x1], 1 }
 0x1b4   :  { %763 = vsyncpa [#allocation4], 1 }
 0x1b5   :  { %765 = vsyncpa [#allocation4 + $0x1], 1 }
 0x1b6   :  { %766 = vsyncpa [#allocation6], 1 }

</bundles_post_ra>
